<compile_context>
chip_gen: v7x
topology: tpu7x:2x2x1
jax: 0.10.0
libtpu: 0.0.40
codegen_flags: <defaults>
</compile_context>

<pallas_src>
import functools

import jax
import jax.numpy as jnp
from jax.experimental import pallas as pl
from jax.experimental.pallas import tpu as pltpu

_MXU_DTYPE = jnp.bfloat16           # MXU operand dtype (accumulation stays f32)
_ACT_DTYPE = jnp.bfloat16           # inter-kernel activation dtype


def _vmem_limit_bytes():
    """Generation-aware VMEM budget: ~75% of physical capacity (96 MiB on
    v5e/v6e's 128 MiB, 48 MiB on v7x's 64 MiB), with a safe fallback."""
    try:
        cap = getattr(pltpu.get_tpu_info(), "vmem_capacity_bytes", None)
        if cap:
            return int(cap) * 3 // 4
    except Exception:
        pass
    return 48 * 1024 * 1024


_VMEM_LIMIT = _vmem_limit_bytes()


def _divisor_tile(n, target):
    """Largest divisor of n that is <= target (>= 1)."""
    t = max(1, min(n, target))
    while n % t:
        t -= 1
    return t


def _cout_tile(cout):
    """Output-channel tile: full width when small, else 256 (v6e/v7x MXU column
    width) falling back to 128 (v5e's MXU width)."""
    for t in (256, 128):
        if cout > t and cout % t == 0:
            return t
    return cout


# ------------------------------ Pallas kernels ------------------------------

def _upconv2x2_kernel(x_ref, w_ref, b_ref, o_ref):
    """ConvTranspose2d(k=2, s=2) for one (batch, row-tile) grid cell.

    x:(1,TH,W,Cin)  w:(2,Cin,2*Cout) = (dh, Cin, (dw,cout))  b:(1,2*Cout)
    o:(1,TH,2,W,2*Cout)  -- both dh phases computed from one resident x block;
    the wrapper reshape to (N,2H,2W,Cout) is a zero-copy row-major view.
    """
    _, th, w, cin = x_ref.shape
    two_cout = w_ref.shape[-1]
    x2 = x_ref[...].reshape(th * w, cin)
    b = b_ref[...]
    for dh in range(2):
        y = jnp.dot(x2, w_ref[dh], preferred_element_type=jnp.float32) + b
        o_ref[0, :, dh, :, :] = y.reshape(th, w, two_cout).astype(o_ref.dtype)


def _conv3x3_kernel(*refs, padding, has_skip, has_head):
    """Fused 3x3 conv (+ optional fused channel-concat as split-K) + folded BN
    + ReLU (+ optional fused 1x1 output head).

    Ref order:  x, [skip], wx, [ws], scale, shift, [head_w, head_b],
                o, xpad, [spad], acc
    Conv weights have kw folded into K:  (3, 3*Cin_part, TC).
    """
    it = iter(refs)
    x_ref = next(it)
    s_ref = next(it) if has_skip else None
    wx_ref = next(it)
    ws_ref = next(it) if has_skip else None
    scale_ref = next(it)
    shift_ref = next(it)
    hw_ref = next(it) if has_head else None
    hb_ref = next(it) if has_head else None
    o_ref = next(it)
    xpad_ref = next(it)
    spad_ref = next(it) if has_skip else None
    acc_ref = next(it)

    p = padding
    _, hin, win, _ = x_ref.shape
    _, ho, wo, _ = o_ref.shape
    hp, wp = hin + 2 * p, win + 2 * p

    def fill_pad(pad_ref, src_ref):
        c = pad_ref.shape[-1]
        if p > 0:  # zero only the p-wide halo border, then copy the interior
            zrow = jnp.zeros((p, wp, c), pad_ref.dtype)
            pad_ref[0:p, :, :] = zrow
            pad_ref[hp - p:hp, :, :] = zrow
            zcol = jnp.zeros((hin, p, c), pad_ref.dtype)
            pad_ref[p:p + hin, 0:p, :] = zcol
            pad_ref[p:p + hin, wp - p:wp, :] = zcol
        pad_ref[p:p + hin, p:p + win, :] = src_ref[0]

    # x / skip blocks are invariant along the Cout-tile grid axis, so the
    # padded scratch is (re)built only on the first Cout tile of each batch.
    @pl.when(pl.program_id(1) == 0)
    def _():
        fill_pad(xpad_ref, x_ref)
        if has_skip:
            fill_pad(spad_ref, s_ref)

    def accum(pad_ref, w_ref, first):
        # kw folded into K: 3 matmuls of K = 3*Cin instead of 9 of K = Cin.
        cin = pad_ref.shape[-1]
        for kh in range(3):
            patch = jnp.concatenate(
                [pad_ref[kh:kh + ho, kw:kw + wo, :] for kw in range(3)],
                axis=-1)
            patch = patch.reshape(ho * wo, 3 * cin).astype(_MXU_DTYPE)
            d = jnp.dot(patch, w_ref[kh], preferred_element_type=jnp.float32)
            if first:
                acc_ref[...] = d
                first = False
            else:
                acc_ref[...] += d

    accum(xpad_ref, wx_ref, first=True)
    if has_skip:                       # torch.cat([x, skip], dim=1) as split-K
        accum(spad_ref, ws_ref, first=False)

    y = jnp.maximum(acc_ref[...] * scale_ref[...] + shift_ref[...], 0.0)
    if has_head:                       # fused 1x1 OutputBlock epilogue
        y = jnp.dot(y, hw_ref[...], preferred_element_type=jnp.float32)
        y = y + hb_ref[...]
    o_ref[...] = y.reshape(o_ref.shape).astype(o_ref.dtype)


# -------------------------- layer-level wrappers ----------------------------

def _conv_transpose2x2(x, up_w, up_b):
    """ConvTranspose2d(k=2,s=2).  up_w:(2, Cin, 2*Cout) = (dh, Cin, (dw,cout)).
    Output is written as (N, H, 2, W, 2*Cout); the reshape to (N, 2H, 2W, Cout)
    is a zero-copy row-major view."""
    n, h, w, cin = x.shape
    two_cout = up_w.shape[-1]
    cout = two_cout // 2
    th = _divisor_tile(h, max(1, 1024 // max(w, 1)))
    grid = (n, h // th)
    flops = 2 * n * h * w * cin * 2 * two_cout
    bytes_accessed = (x.size * x.dtype.itemsize
                      + up_w.size * up_w.dtype.itemsize
                      + n * h * w * 2 * two_cout * jnp.dtype(_ACT_DTYPE).itemsize)
    y = pl.pallas_call(
        _upconv2x2_kernel,
        out_shape=jax.ShapeDtypeStruct((n, h, 2, w, two_cout), _ACT_DTYPE),
        grid_spec=pltpu.PrefetchScalarGridSpec(
            num_scalar_prefetch=0,
            grid=grid,
            in_specs=[
                pl.BlockSpec((1, th, w, cin), lambda ni, hi: (ni, hi, 0, 0)),
                pl.BlockSpec((2, cin, two_cout), lambda ni, hi: (0, 0, 0)),
                pl.BlockSpec((1, two_cout), lambda ni, hi: (0, 0)),
            ],
            out_specs=pl.BlockSpec((1, th, 2, w, two_cout),
                                   lambda ni, hi: (ni, hi, 0, 0, 0)),
        ),
        compiler_params=pltpu.CompilerParams(
            dimension_semantics=("parallel", "parallel"),
            vmem_limit_bytes=_VMEM_LIMIT),
        cost_estimate=pl.CostEstimate(flops=int(flops), transcendentals=0,
                                      bytes_accessed=int(bytes_accessed)),
    )(x, up_w, up_b)
    return y.reshape(n, 2 * h, 2 * w, cout)


def _conv3x3_bn_relu(x, skip, conv_p, padding, head=None):
    """3x3 conv + folded BN + ReLU; if `skip` is given the channel concat is
    fused as split-K; if `head` is given the 1x1 OutputBlock is fused into the
    epilogue.  Grid = (batch, Cout tiles)."""
    n, hin, win, cx = x.shape
    cout = conv_p["scale"].shape[-1]
    ho = hin + 2 * padding - 2
    wo = win + 2 * padding - 2
    hp, wp = hin + 2 * padding, win + 2 * padding
    tc = cout if head is not None else _cout_tile(cout)
    grid = (n, cout // tc)
    has_skip = skip is not None

    in_specs = [pl.BlockSpec((1, hin, win, cx), lambda ni, ci: (ni, 0, 0, 0))]
    args = [x]
    cin_total = cx
    if has_skip:
        cs = skip.shape[-1]
        cin_total += cs
        in_specs.append(
            pl.BlockSpec((1, hin, win, cs), lambda ni, ci: (ni, 0, 0, 0)))
        args.append(skip)
    in_specs.append(pl.BlockSpec((3, 3 * cx, tc), lambda ni, ci: (0, 0, ci)))
    args.append(conv_p["wx"])
    if has_skip:
        in_specs.append(pl.BlockSpec((3, 3 * cs, tc), lambda ni, ci: (0, 0, ci)))
        args.append(conv_p["ws"])
    in_specs += [pl.BlockSpec((1, tc), lambda ni, ci: (0, ci)),
                 pl.BlockSpec((1, tc), lambda ni, ci: (0, ci))]
    args += [conv_p["scale"], conv_p["shift"]]

    if head is not None:
        nclass = head["w"].shape[-1]
        in_specs += [pl.BlockSpec((cout, nclass), lambda ni, ci: (0, 0)),
                     pl.BlockSpec((1, nclass), lambda ni, ci: (0, 0))]
        args += [head["w"], head["b"]]
        c_out_total, c_out_block = nclass, nclass
        out_dtype = jnp.float32
        out_index = lambda ni, ci: (ni, 0, 0, 0)
    else:
        c_out_total, c_out_block = cout, tc
        out_dtype = _ACT_DTYPE
        out_index = lambda ni, ci: (ni, 0, 0, ci)

    scratch = [pltpu.VMEM((hp, wp, cx), x.dtype)]
    if has_skip:
        scratch.append(pltpu.VMEM((hp, wp, cs), skip.dtype))
    scratch.append(pltpu.VMEM((ho * wo, tc), jnp.float32))

    kernel = functools.partial(_conv3x3_kernel, padding=padding,
                               has_skip=has_skip, has_head=head is not None)

    flops = 2 * n * ho * wo * 9 * cin_total * cout
    bytes_accessed = (sum(a.size * a.dtype.itemsize for a in args)
                      + n * ho * wo * c_out_total * jnp.dtype(out_dtype).itemsize)
    return pl.pallas_call(
        kernel,
        out_shape=jax.ShapeDtypeStruct((n, ho, wo, c_out_total), out_dtype),
        grid_spec=pltpu.PrefetchScalarGridSpec(
            num_scalar_prefetch=0,
            grid=grid,
            in_specs=in_specs,
            out_specs=pl.BlockSpec((1, ho, wo, c_out_block), out_index),
            scratch_shapes=scratch),
        compiler_params=pltpu.CompilerParams(
            dimension_semantics=("parallel", "arbitrary"),
            vmem_limit_bytes=_VMEM_LIMIT),
        cost_estimate=pl.CostEstimate(flops=int(flops), transcendentals=0,
                                      bytes_accessed=int(bytes_accessed)),
    )(*args)


# --------------------------- parameter construction -------------------------

def _fold_conv_bn(w, b, cin_split, eps=1e-5):
    """w:(cout, cin, 3, 3).  Folds kw into K for the kernel layout and folds
    eval-mode BatchNorm2d (default running stats) into a scale/shift pair.
    NOTE: with trained BN stats, scale = gamma/sqrt(var+eps) and shift must
    also fold (bias - mean) and beta."""
    cout = w.shape[0]
    scale = jnp.ones((cout,), jnp.float32) / jnp.sqrt(1.0 + eps)
    shift = b * scale

    def fold(part):
        # (cout, cpart, 3, 3) -> (kh, kw, cpart, cout) -> (3, 3*cpart, cout)
        return (jnp.transpose(part, (2, 3, 1, 0))
                .reshape(3, 3 * part.shape[1], cout).astype(_MXU_DTYPE))

    wx = fold(w[:, :cin_split])
    ws = fold(w[:, cin_split:]) if cin_split < w.shape[1] else None
    return {"wx": wx, "ws": ws,
            "scale": scale.reshape(1, cout), "shift": shift.reshape(1, cout)}


def init_decoder_params(key, in_channels, out_channels, num_class, size=4):
    """Builds params with every weight reshape/transpose precomputed once
    (bf16 MXU operands, f32 bias / folded-BN scale/shift)."""
    keys = jax.random.split(key, size * 6 + 2)
    ki = 0
    params = {"stages": [], "out": None}
    cin, cout = in_channels, out_channels
    for _ in range(size):
        up_w = 0.1 * jax.random.normal(keys[ki], (cin, cout, 2, 2), jnp.float32); ki += 1
        up_b = 0.1 * jax.random.normal(keys[ki], (cout,), jnp.float32); ki += 1
        # (Cin, Cout, dh, dw) -> (dh, Cin, (dw, cout))
        up_wq = jnp.transpose(up_w, (2, 0, 3, 1)).reshape(2, cin, 2 * cout)
        up_wq = up_wq.astype(_MXU_DTYPE)
        up_bq = jnp.tile(up_b, 2).reshape(1, 2 * cout)
        convs = []
        c_in_conv = cin                 # channels after concat(x_up, skip)
        for conv_i in range(2):
            w = 0.1 * jax.random.normal(keys[ki], (cout, c_in_conv, 3, 3),
                                        jnp.float32); ki += 1
            b = 0.1 * jax.random.normal(keys[ki], (cout,), jnp.float32); ki += 1
            split = cout if conv_i == 0 else c_in_conv
            convs.append(_fold_conv_bn(w, b, split))
            c_in_conv = cout
        params["stages"].append({"up_w": up_wq, "up_b": up_bq, "convs": convs})
        cin //= 2
        cout //= 2
    head_cin = cout * 2
    ow = 0.1 * jax.random.normal(keys[ki], (num_class, head_cin, 1, 1),
                                 jnp.float32); ki += 1
    ob = 0.1 * jax.random.normal(keys[ki], (num_class,), jnp.float32)
    params["out"] = {"w": ow.reshape(num_class, head_cin).T.astype(jnp.float32),
                     "b": ob.reshape(1, num_class)}
    return params


# ------------------------------ Decoder forward ------------------------------

def decoder_forward(params, x_nchw, routes_connection, padding):
    """Mirrors Decoder.forward: alternating ConvTranspose / (cat + MultiCNN),
    with the OutputBlock fused into the last conv.  Inputs / outputs are NCHW
    f32 like PyTorch."""
    x = jnp.transpose(x_nchw, (0, 2, 3, 1)).astype(_ACT_DTYPE)        # NHWC
    skips = [jnp.transpose(r, (0, 2, 3, 1)).astype(_ACT_DTYPE)
             for r in routes_connection]
    last = len(params["stages"]) - 1
    for si, stage in enumerate(params["stages"]):
        x = _conv_transpose2x2(x, stage["up_w"], stage["up_b"])
        skip = skips.pop(-1)
        # torch.cat([x, skip], dim=1) + first conv, fused as split-K
        x = _conv3x3_bn_relu(x, skip, stage["convs"][0], padding)
        head = params["out"] if si == last else None
        x = _conv3x3_bn_relu(x, None, stage["convs"][1], padding, head=head)
    return jnp.transpose(x, (0, 3, 1, 2)).astype(jnp.float32)         # NCHW


# ------------------------------------ main -----------------------------------

if __name__ == "__main__":
    in_channels, out_channels, num_class, padding, size = 64, 32, 3, 1, 4
    N, H0, W0 = 2, 2, 2

    params = init_decoder_params(jax.random.PRNGKey(0),
                                 in_channels, out_channels, num_class, size)

    data_keys = jax.random.split(jax.random.PRNGKey(0), size + 1)
    x = jax.random.normal(data_keys[0], (N, in_channels, H0, W0), jnp.float32)

    # routes_connection as produced by an encoder: shallow (big spatial, few
    # channels) first, deep last; Decoder pops from the end (deepest first).
    routes = []
    for i in reversed(range(size)):
        ch = (in_channels // (2 ** i)) - (out_channels // (2 ** i))
        sp_h = H0 * (2 ** (i + 1))
        sp_w = W0 * (2 ** (i + 1))
        routes.append(jax.random.normal(data_keys[1 + i], (N, ch, sp_h, sp_w),
                                        jnp.float32))

    y = decoder_forward(params, x, routes, padding)
    y = jax.block_until_ready(y)

    expected = (N, num_class, H0 * 2 ** size, W0 * 2 ** size)
    assert y.shape == expected, (y.shape, expected)
    assert bool(jnp.all(jnp.isfinite(y)))
    print("KERNEL_OK")
</pallas_src>

<mosaic_0001>
module attributes {stable_mosaic.version = 11 : i64} {
  func.func @_upconv2x2_kernel(%arg0: i32, %arg1: i32, %arg2: memref<1x2x2x64xbf16, #tpu.memory_space<vmem>>, %arg3: memref<2x64x64xbf16, #tpu.memory_space<vmem>>, %arg4: memref<1x64xf32, #tpu.memory_space<vmem>>, %arg5: memref<1x2x2x2x64xbf16, #tpu.memory_space<vmem>>) attributes {dimension_semantics = [#tpu.dimension_semantics<parallel>, #tpu.dimension_semantics<parallel>], iteration_bounds = array<i64: 2, 1>, scalar_prefetch = 0 : i64, scratch_operands = 0 : i64, tpu.core_type = #tpu.core_type<tc>, window_params = [{transform_indices = @transform_0, window_bounds = array<i64: 1, 2, 2, 64>}, {pipeline_mode = #tpu.pipeline_mode<synchronous>, transform_indices = @transform_1, window_bounds = array<i64: 2, 64, 64>}, {pipeline_mode = #tpu.pipeline_mode<synchronous>, transform_indices = @transform_2, window_bounds = array<i64: 1, 64>}, {transform_indices = @transform_3, window_bounds = array<i64: 1, 2, 2, 2, 64>}]} {
    %c0 = arith.constant 0 : index
    %c0_0 = arith.constant 0 : index
    %c0_1 = arith.constant 0 : index
    %c0_2 = arith.constant 0 : index
    %0 = vector.load %arg2[%c0, %c0_0, %c0_1, %c0_2] : memref<1x2x2x64xbf16, #tpu.memory_space<vmem>>, vector<1x2x2x64xbf16>
    %1 = vector.shape_cast %0 : vector<1x2x2x64xbf16> to vector<4x64xbf16>
    %c0_3 = arith.constant 0 : index
    %c0_4 = arith.constant 0 : index
    %2 = vector.load %arg4[%c0_3, %c0_4] : memref<1x64xf32, #tpu.memory_space<vmem>>, vector<1x64xf32>
    %c0_5 = arith.constant 0 : index
    %c0_6 = arith.constant 0 : index
    %c0_7 = arith.constant 0 : index
    %3 = vector.load %arg3[%c0_5, %c0_6, %c0_7] : memref<2x64x64xbf16, #tpu.memory_space<vmem>>, vector<1x64x64xbf16>
    %4 = vector.shape_cast %3 : vector<1x64x64xbf16> to vector<64x64xbf16>
    %cst = arith.constant dense<0.000000e+00> : vector<4x64xf32>
    %5 = tpu.matmul %1, %4, %cst {dimension_numbers = #tpu.dot_dimension_numbers<[1], [0], [0], [1], [0, 0, 1, 1], [], []>} : vector<4x64xbf16>, vector<64x64xbf16>, vector<4x64xf32> -> vector<4x64xf32>
    %6 = vector.broadcast %2 : vector<1x64xf32> to vector<4x64xf32>
    %7 = arith.addf %5, %6 : vector<4x64xf32>
    %8 = vector.shape_cast %7 : vector<4x64xf32> to vector<2x2x64xf32>
    %9 = arith.truncf %8 : vector<2x2x64xf32> to vector<2x2x64xbf16>
    %c0_8 = arith.constant 0 : index
    %c0_9 = arith.constant 0 : index
    %c0_10 = arith.constant 0 : index
    %c0_11 = arith.constant 0 : index
    %c0_12 = arith.constant 0 : index
    %10 = vector.load %arg5[%c0_8, %c0_9, %c0_10, %c0_11, %c0_12] : memref<1x2x2x2x64xbf16, #tpu.memory_space<vmem>>, vector<1x2x1x2x64xbf16>
    %11 = vector.shape_cast %10 : vector<1x2x1x2x64xbf16> to vector<2x2x64xbf16>
    %12 = vector.shape_cast %9 : vector<2x2x64xbf16> to vector<1x2x1x2x64xbf16>
    tpu.vector_store %arg5[%c0_8, %c0_9, %c0_10, %c0_11, %c0_12], %12 {strides = array<i32>} : memref<1x2x2x2x64xbf16, #tpu.memory_space<vmem>>, vector<1x2x1x2x64xbf16>,
    %c1 = arith.constant 1 : index
    %c0_13 = arith.constant 0 : index
    %c0_14 = arith.constant 0 : index
    %13 = vector.load %arg3[%c1, %c0_13, %c0_14] : memref<2x64x64xbf16, #tpu.memory_space<vmem>>, vector<1x64x64xbf16>
    %14 = vector.shape_cast %13 : vector<1x64x64xbf16> to vector<64x64xbf16>
    %cst_15 = arith.constant dense<0.000000e+00> : vector<4x64xf32>
    %15 = tpu.matmul %1, %14, %cst_15 {dimension_numbers = #tpu.dot_dimension_numbers<[1], [0], [0], [1], [0, 0, 1, 1], [], []>} : vector<4x64xbf16>, vector<64x64xbf16>, vector<4x64xf32> -> vector<4x64xf32>
    %16 = vector.broadcast %2 : vector<1x64xf32> to vector<4x64xf32>
    %17 = arith.addf %15, %16 : vector<4x64xf32>
    %18 = vector.shape_cast %17 : vector<4x64xf32> to vector<2x2x64xf32>
    %19 = arith.truncf %18 : vector<2x2x64xf32> to vector<2x2x64xbf16>
    %c0_16 = arith.constant 0 : index
    %c0_17 = arith.constant 0 : index
    %c1_18 = arith.constant 1 : index
    %c0_19 = arith.constant 0 : index
    %c0_20 = arith.constant 0 : index
    %20 = vector.load %arg5[%c0_16, %c0_17, %c1_18, %c0_19, %c0_20] : memref<1x2x2x2x64xbf16, #tpu.memory_space<vmem>>, vector<1x2x1x2x64xbf16>
    %21 = vector.shape_cast %20 : vector<1x2x1x2x64xbf16> to vector<2x2x64xbf16>
    %22 = vector.shape_cast %19 : vector<2x2x64xbf16> to vector<1x2x1x2x64xbf16>
    tpu.vector_store %arg5[%c0_16, %c0_17, %c1_18, %c0_19, %c0_20], %22 {strides = array<i32>} : memref<1x2x2x2x64xbf16, #tpu.memory_space<vmem>>, vector<1x2x1x2x64xbf16>,
    return
  }
  func.func @transform_0(%arg0: i32, %arg1: i32) -> (i32, i32, i32, i32) {
    %c0_i32 = arith.constant 0 : i32
    %c0_i32_0 = arith.constant 0 : i32
    %c0_i32_1 = arith.constant 0 : i32
    return %arg0, %arg1, %c0_i32, %c0_i32_0 : i32, i32, i32, i32
  }
  func.func @transform_1(%arg0: i32, %arg1: i32) -> (i32, i32, i32) {
    %c0_i32 = arith.constant 0 : i32
    %c0_i32_0 = arith.constant 0 : i32
    %c0_i32_1 = arith.constant 0 : i32
    %c0_i32_2 = arith.constant 0 : i32
    return %c0_i32, %c0_i32_0, %c0_i32_1 : i32, i32, i32
  }
  func.func @transform_2(%arg0: i32, %arg1: i32) -> (i32, i32) {
    %c0_i32 = arith.constant 0 : i32
    %c0_i32_0 = arith.constant 0 : i32
    %c0_i32_1 = arith.constant 0 : i32
    return %c0_i32, %c0_i32_0 : i32, i32
  }
  func.func @transform_3(%arg0: i32, %arg1: i32) -> (i32, i32, i32, i32, i32) {
    %c0_i32 = arith.constant 0 : i32
    %c0_i32_0 = arith.constant 0 : i32
    %c0_i32_1 = arith.constant 0 : i32
    %c0_i32_2 = arith.constant 0 : i32
    return %arg0, %arg1, %c0_i32, %c0_i32_0, %c0_i32_1 : i32, i32, i32, i32, i32
  }
}

</mosaic_0001>

<bundles_post_ra>
// kernel: tpu_custom_call.1
= control target key start
LH: loop header
LB: loop body
LE: loop exit
PB: predicated region body
PF: predicated region fallthrough
CT: control target
= control target key end

     0   :  { %8 = vsyncpa [#allocation3], 0  ;;  %s1113_s0 = inlined_call_operand.hbm [shape: bf16[2,2,2,64], index: 0, kind: input, shape index: {}]   ;;  %s1114_s1 = inlined_call_operand.hbm [shape: bf16[2,64,64], index: 1, kind: input, shape index: {}]   ;;  %s1115_s2 = inlined_call_operand.vmem [shape: f32[1,64], index: 2, kind: input, shape index: {}]   ;;  %s1116_s3 = inlined_call_operand.hbm [shape: bf16[2,2,2,2,64], index: 3, kind: output, shape index: {}]  }
   0x1   :  { %10 = vsyncpa [#allocation3 + $0x1], 0 }
   0x2   :  { %11 = vsyncpa [#allocation6], 0 }
   0x3   :  { %12 = vsyncpa [#allocation4], 0 }
   0x4   :  { %14 = vsyncpa [#allocation4 + $0x1], 0  ;;  %s882_s12 = smov 0   ;;  %s884_s13 = smov 0  }
   0x5   :  { %s886_s14 = smov 0   ;;  %s888_s15 = smov 0  }
   0x6   :  { %s890_s16 = smov 0   ;;  %s892_s17 = smov 0  }
   0x7 LB: > { %s546_s18 = sadd.s32 4294967295, %s847_s17   ;;  %s547_s19 = sadd.s32 4294967294, %s847_s17   ;;  %s847_s17 = sphi %s892_s17, %s20_s17   ;;  %s843_s16 = sphi %s890_s16, %s1140_s16   ;;  %s839_s15 = sphi %s888_s15, %s1139_s15   ;;  %s835_s14 = sphi %s886_s14, %s1138_s14   ;;  %s831_s13 = sphi %s884_s13, %s1137_s13   ;;  %s827_s12 = sphi %s882_s12, %s1136_s12  }
   0x8   : > { %p54_p0 = scmp.ne.s32.totalorder %s831_s13, %s827_s12  ;;  %p916_p1 = scmp.eq.s32.totalorder %s546_s18, 0 }
   0x9   : > { %p920_p2 = scmp.eq.s32.totalorder %s546_s18, 1  ;;  %p128_p3 = scmp.eq.s32.totalorder %s547_s19, 1 }
   0xa   : > { %s1121_s20 = scalar_select %p916_p1, 1, 0 }
   0xb   : > { %s1122_s21 = scalar_select %p920_p2, 1, 0 }
   0xc   : > { %p926_p4 = por %p916_p1, %p54_p0  ;;  %p548_p5 = scmp.ge.s32.totalorder %s847_s17, 1 }
   0xd   : > { %p931_p6 = por %p128_p3, %p54_p0  ;;  %p135_p7 = scmp.lt.s32.totalorder %s847_s17, 3 }
   0xe   : > { %s1123_s22 = scalar_select %p926_p4, 1, 0 }
   0xf   : > { %s1124_s23 = scalar_select %p931_p6, 1, 0 }
  0x10   : > { %p936_p8 = pnand %p548_p5, %p135_p7  ;;  %s849_s25 = smov [#allocation5]  }
  0x11   : > { %s147_s26 = sshll.u32 %s849_s25, 4  ;;  %s32_s28 = sadd.s32 1, %s843_s16  ;;  %s148_s26 = int_to_ptr.vmem [resolvable:$true] %s147_s26 }
  0x12   : > { %s1125_s24 = scalar_select %p936_p8, 1, 0 }
  0x13   : > { %p620_p9 = pneg %p936_p8  ;;  %s703_s4 = scalar_lea.hbm %s1114_s1, 1024 }
  0x14   : > { %p704_p12 = scmp.ne.s32.totalorder %s1114_s1, %s703_s4  ;;  %p710_p5 = scmp.lt.u32.totalorder %s703_s4, %s1114_s1 }
  0x15   : > { %p945_p11 = pnand %p620_p9, %p916_p1 }
  0x17   : > { %p705_p13 = pneg %p945_p11 }
  0x19   : > { %p706_p0 = pnand %p705_p13, %p704_p12 }
  0x1b   : > { %p707_p3 = pneg %p706_p0 }
  0x1d   : > { %p712_p7 = pnand %p710_p5, %p707_p3 }
  0x1f   : > { %715 = shalt.err (!%p712_p7)
}
  0x20   : > { %s716_s9 = scalar_lea.vmem %s148_s26, 1024  ;;  %p724_p1 = scmp.lt.s32.totalorder %s148_s26, %s148_s26 }
  0x21   : > { %p717_p9 = scmp.ne.s32.totalorder %s148_s26, %s716_s9  ;;  %p725_p4 = scmp.lt.s32.totalorder %s716_s9, %s716_s9 }
  0x23   : > { %p719_p10 = pnand %p717_p9, %p705_p13  ;;  %p726_p8 = por %p725_p4, %p724_p1 }
  0x25   : > { %p720_p6 = pneg %p719_p10 }
  0x27   : > { %p727_p2 = pnand %p726_p8, %p720_p6 }
  0x29   : > { %730 = shalt.err (!%p727_p2)
}
  0x2a   : > { %s850_s10 = smov 64   ;;  %s851_s11 = smov 4  }
  0x2b   : > { %623 = dma.hbm_to_vmem [thread:$0]  (!%p945_p11), %s1114_s1, 1024, %s148_s26, [#allocation6], %s850_s10, %s850_s10, %s851_s11  }
  0x2c   : > { %p34_p1 = scmp.ge.s32.totalorder %s32_s28, 2  ;;  %s41_s25 = sadd.s32 1, %s835_s14 }
  0x2d   : > { %p48_p2 = scmp.ne.s32.totalorder %s835_s14, %s831_s13  ;;  %p49_p4 = scmp.eq.s32.totalorder %s847_s17, 0 }
  0x2e   : > { %s1142_s28 = smov (%p34_p1, %s32_s28), 0  ;;  %p1128_p8 = scmp.ne.s32.totalorder %s1122_s21, 0 }
  0x2f   : > { %p972_p6 = por %p49_p4, %p48_p2  ;;  %s36_s27 = ssub.s32 %s843_s16, %s1142_s28 }
  0x30   : > { %p978_p10 = por %p1128_p8, %p48_p2  ;;  %p633_p12 = scmp.lt.s32.totalorder %s847_s17, 2 }
  0x31   : > { %p39_p11 = scmp.eq.s32.totalorder %s36_s27, 0  ;;  %s164_s26 = sand.u32 1, %s835_s14  }
  0x32   : > { %s551_s4 = sshll.u32 %s164_s26, 1  ;;  %s576_s6 = sshll.u32 %s843_s16, 5 }
  0x33   : > { %s987_s5 = scalar_select %p39_p11, %s835_s14, %s41_s25  }
  0x34   : > { %s993_s9 = scalar_lea.hbm %s1113_s0, %s576_s6  ;;  %s168_s21 = scalar_lea.vmem [#allocation2], %s551_s4 }
  0x35   : > { %s177_s10 = sshll.u32 %s168_s21, 4  ;;  %p999_p13 = pnand %p633_p12, %p972_p6  ;;  %s995_s10 = int_to_ptr.vmem [resolvable:$true] %s177_s10 }
  0x36   : > { %s1003_s18 = scalar_lea.sflag [#allocation3], %s164_s26  ;;  %s731_s19 = scalar_lea.hbm %s993_s9, 32 }
  0x37   : > { %p732_p0 = scmp.ne.s32.totalorder %s993_s9, %s731_s19  ;;  %p733_p3 = pneg %p999_p13 }
  0x38   : > { %s736_s29 = scalar_lea.hbm %s1113_s0, 64  ;;  %p737_p9 = scmp.lt.u32.totalorder %s993_s9, %s1113_s0 }
  0x39   : > { %p734_p5 = pnand %p733_p3, %p732_p0  ;;  %p738_p1 = scmp.lt.u32.totalorder %s736_s29, %s731_s19 }
  0x3a   : > { %p740_p4 = scmp.lt.u32.totalorder %s731_s19, %s993_s9 }
  0x3b   : > { %p735_p7 = pneg %p734_p5  ;;  %p739_p2 = por %p738_p1, %p737_p9 }
  0x3d   : > { %p741_p6 = por %p740_p4, %p739_p2 }
  0x3f   : > { %p742_p8 = pnand %p741_p6, %p735_p7 }
  0x41   : > { %745 = shalt.err (!%p742_p8)
}
  0x42   : > { %s746_s26 = scalar_lea.vmem %s995_s10, 32  ;;  %s852_s7 = smov [#allocation2]  }
  0x43   : > { %p747_p12 = scmp.ne.s32.totalorder %s995_s10, %s746_s26  ;;  %s751_s8 = sshll.u32 %s852_s7, 4  ;;  %s752_s8 = int_to_ptr.vmem [resolvable:$false] %s751_s8 }
  0x44   : > { %s753_s21 = scalar_lea.vmem %s752_s8, 64  ;;  %p754_p5 = scmp.lt.s32.totalorder %s995_s10, %s752_s8 }
  0x45   : > { %p749_p11 = pnand %p747_p12, %p733_p3  ;;  %p755_p9 = scmp.lt.s32.totalorder %s753_s21, %s746_s26 }
  0x47   : > { %p750_p0 = pneg %p749_p11  ;;  %p756_p1 = por %p755_p9, %p754_p5 }
  0x49   : > { %p757_p2 = pnand %p756_p1, %p750_p0 }
  0x4b   : > { %760 = shalt.err (!%p757_p2)
}
  0x4c   : > { %s853_s19 = smov 16   ;;  %s854_s25 = smov 1  }
  0x4d   : > { %627 = dma.hbm_to_vmem [thread:$0]  (!%p999_p13), %s993_s9, 32, %s995_s10, %s1003_s18, %s853_s19, %s853_s19, %s854_s25  }
  0x4e   : > { %p1131_p3 = scmp.ne.s32.totalorder %s1125_s24, 0 }
  0x4f   : > { %s1034_s27 = sand.u32 (!%p1131_p3), 1, %s831_s13   ;;  %p1132_p7 = scmp.ne.s32.totalorder (!%p1131_p3), %s1123_s22, 0 }
  0x50   : > { %189 = sbr.rel (%p1131_p3) target bundleno = 344 (0x158), region = 32  ;;  %s555_s29 = sshll.u32 (!%p1131_p3), %s1034_s27, 1 }
  0x51   : > { %s192_s4 = scalar_lea.sflag (!%p1131_p3), [#allocation3], %s1034_s27  ;;  %s1038_s6 = scalar_lea.vmem (!%p1131_p3), [#allocation2], %s555_s29 }
  0x57   : > { %814 = dma.done.wait (%p1132_p7), %s192_s4, 32  }
  0x58   : > { %816 = vsyncadd (%p1132_p7), %s192_s4, 4294967264  ;;  %p1133_p13 = scmp.ne.s32.totalorder %s1121_s20, 0 }
  0x5a   : > { %818 = dma.done.wait (%p1133_p13), [#allocation6], 1024  }
  0x5b   : > { %820 = vsyncadd (%p1133_p13), [#allocation6], 4294966272  ;;  %v855_v0 = vmov 0.0   ;;  %vm856_vm0 = vmmov 0   ;;  %v857_v1 = vmov 1966171168   ;;  %v248_v3 = vlaneseq }
  0x5c   : > { %588 = vmatprep.subr.bf16.mxu0 %v855_v0  ;;  %600 = vmatprep.subr.bf16.mxu1 %v855_v0  ;;  %v246_v2 = vunpack.c.l.s4 %v857_v1  ;;  %v695_v4 = vld [vmem:[#allocation5] sm:$0xff]   ;;  %v697_v6 = vld [vmem:[#allocation5 + $0x8] sm:$0xff]   ;;  %v699_v10 = vld [vmem:[#allocation5 + $0x10] sm:$0xff]   ;;  %vm283_vm1 = vcmask 523264   ;;  %v858_v20 = vmov 1983009808  }
  0x5d   : > { %596 = vmatprep.mubr.msk.bf16.mxu0 %vm856_vm0, %v855_v0  ;;  %608 = vmatprep.mubr.msk.bf16.mxu1 %vm856_vm0, %v855_v0  ;;  %v696_v5 = vld [vmem:[#allocation5 + $0x20] sm:$0xff]   ;;  %v698_v7 = vld [vmem:[#allocation5 + $0x28] sm:$0xff]   ;;  %v249_v9 = vshrl.u32 %v248_v3, 7  ;;  %v700_v11 = vld [vmem:[#allocation5 + $0x30] sm:$0xff]   ;;  %v329_v21 = vunpack.c.l.s4 %v858_v20  ;;  %s557_s20 = sshll.u32 %s1034_s27, 2  ;;  %vm340_vm2 = vcmask 516096  }
  0x5e   : > { %589 = vmatpush3.bf16.msra.mxu0 %v695_v4  ;;  %601 = vmatpush3.bf16.msra.mxu1 %v696_v5  ;;  %v247_v8 = vunpack.c.0.s8 %v246_v2  ;;  %v225_v13 = vld [vmem:[%s1038_s6] sm:$0x1]  ;;  %v226_v14 = vld [vmem:[%s1038_s6 + $0x1] sm:$0x1]  ;;  %s577_s9 = sshll.u32 %s839_s15, 6  ;;  %s221_s10 = scalar_lea.vmem [#allocation7], %s557_s20 }
  0x5f   : > { %590 = vmatprep.subr.bf16.mxu0 %v855_v0  ;;  %602 = vmatprep.subr.bf16.mxu1 %v855_v0  ;;  %v244_v15 = vcombine.low %v225_v13, %v226_v14  ;;  %v701_v16 = vld [vmem:[#allocation5 + $0x18] sm:$0xff]   ;;  %v330_v22 = vunpack.c.0.s8 %v329_v21  ;;  %s449_s11 = sshll.u32 %s221_s10, 4  ;;  %s1059_s7 = scalar_lea.hbm %s1116_s3, %s577_s9  ;;  %s1061_s11 = int_to_ptr.vmem [resolvable:$true] %s449_s11 }
  0x60   : > { %v250_v12 = vsub.s32 %v247_v8, %v249_v9  ;;  %v702_v17 = vld [vmem:[#allocation5 + $0x38] sm:$0xff]   ;;  %s433_s15 = scalar_lea.sflag [#allocation4], %s1034_s27  ;;  %s761_s8 = scalar_lea.vmem %s1061_s11, 64 }
  0x61   : > { %v558_v23 = vld [vmem:[%s1115_s2] ss:$0 sm:$0xff]  ;;  %v333_v24 = vsub.s32 %v330_v22, %v249_v9  ;;  %p762_p4 = scmp.ne.s32.totalorder %s1061_s11, %s761_s8  ;;  %s859_s21 = smov [#allocation7]  }
  0x62   : > { %591 = vmatpush3.bf16.msra.mxu0 %v697_v6  ;;  %603 = vmatpush3.bf16.msra.mxu1 %v698_v7  ;;  %v251_v18 = vrot.slane %v244_v15, %v250_v12  ;;  %s765_s19 = sshll.u32 %s859_s21, 4  ;;  %s766_s19 = int_to_ptr.vmem [resolvable:$false] %s765_s19 }
  0x63   : > { %592 = vmatprep.subr.bf16.mxu0 %v855_v0  ;;  %604 = vmatprep.subr.bf16.mxu1 %v855_v0  ;;  %p763_p6 = pnand %p762_p4, %p978_p10  ;;  %s767_s25 = scalar_lea.vmem %s766_s19, 128 }
  0x64   : > { %v258_v19 = vrot.slane %v251_v18, %v250_v12  ;;  %p768_p12 = scmp.lt.s32.totalorder %s1061_s11, %s766_s19  ;;  %p769_p11 = scmp.lt.s32.totalorder %s767_s25, %s761_s8 }
  0x65   : > { %p764_p8 = pneg %p763_p6 }
  0x66   : > { %593 = vmatpush3.bf16.msra.mxu0 %v699_v10  ;;  %605 = vmatpush3.bf16.msra.mxu1 %v700_v11  ;;  %p770_p0 = por %p769_p11, %p768_p12 }
  0x67   : > { %594 = vmatprep.subr.bf16.mxu0 %v855_v0  ;;  %606 = vmatprep.subr.bf16.mxu1 %v855_v0 }
  0x68   : > { %p771_p5 = pnand %p770_p0, %p764_p8 }
  0x6a   : > { %595 = vmatpush3.bf16.msra.mxu0 %v701_v16  ;;  %607 = vmatpush3.bf16.msra.mxu1 %v702_v17 }
  0x6d   : > { %597 = vmatmul.mubr.msk.bf16.vlgmr.msra.gmra.mrb[0].mxu0 %vm283_vm1, %v258_v19  ;;  %609 = vmatmul.mubr.msk.bf16.vlgmr.msra.gmra.mrb[0].mxu1 %vm283_vm1, %v258_v19 }
 0x140   : > { %v321_v25 = vpop.f32.mrb[0].mxu0  ;;  %v410_v27 = vpop.f32.mrb[0].mxu1 }
 0x141   : > { %v322_v26 = vadd.f32 %v558_v23, %v321_v25  ;;  %v598_v28 = vpop.f32.mrb[1].mxu0  ;;  %v411_v29 = vadd.f32 %v558_v23, %v410_v27  ;;  %v610_v30 = vpop.f32.mrb[1].mxu1 }
 0x142   : > { %v324_v31 = vpop.f32.mrb[2].mxu0  ;;  %v413_v33 = vpop.f32.mrb[2].mxu1 }
 0x143   : > { %v334_v32 = vrot.slane %v322_v26, %v333_v24  ;;  %v599_v34 = vpop.f32.mrb[3].mxu0  ;;  %v423_v35 = vrot.slane %v411_v29, %v333_v24  ;;  %v611_v36 = vpop.f32.mrb[3].mxu1 }
 0x145   : > { %v335_v37 = vcombine.high %v334_v32, %v334_v32  ;;  %v338_v38 = vpack.c.bf16 %v334_v32, %v334_v32  ;;  %v424_v39 = vcombine.high %v423_v35, %v423_v35  ;;  %v427_v40 = vpack.c.bf16 %v423_v35, %v423_v35 }
 0x147   : > { %v339_v41 = vpack.c.bf16 %v335_v37, %v335_v37  ;;  %341 = vst.msk [vmem:[%s221_s10] sm:$0x1] %vm340_vm2, %v338_v38  ;;  %v428_v42 = vpack.c.bf16 %v424_v39, %v424_v39  ;;  %569 = vst.msk [vmem:[%s221_s10 + $0x1] sm:$0x1] %vm340_vm2, %v427_v40 }
 0x149   : > { %342 = vst.msk [vmem:[%s221_s10 + $0x2] sm:$0x1] %vm340_vm2, %v339_v41  ;;  %570 = vst.msk [vmem:[%s221_s10 + $0x3] sm:$0x1] %vm340_vm2, %v428_v42 }
 0x14a   : > { %774 = shalt.err (!%p771_p5)
}
 0x14b   : > { %s775_s29 = scalar_lea.hbm %s1059_s7, 64  ;;  %s779_s20 = scalar_lea.hbm %s1116_s3, 128 }
 0x14c   : > { %p776_p9 = scmp.ne.s32.totalorder %s1059_s7, %s775_s29  ;;  %p780_p3 = scmp.lt.u32.totalorder %s1059_s7, %s1116_s3 }
 0x14d   : > { %p781_p7 = scmp.lt.u32.totalorder %s779_s20, %s775_s29  ;;  %p783_p4 = scmp.lt.u32.totalorder %s775_s29, %s1059_s7 }
 0x14e   : > { %p777_p1 = pnand %p776_p9, %p978_p10 }
 0x14f   : > { %p782_p13 = por %p781_p7, %p780_p3 }
 0x150   : > { %p778_p2 = pneg %p777_p1 }
 0x151   : > { %p784_p6 = por %p783_p4, %p782_p13 }
 0x153   : > { %p785_p8 = pnand %p784_p6, %p778_p2 }
 0x155   : > { %788 = shalt.err (!%p785_p8)
}
 0x156   : > { %s860_s9 = smov 16   ;;  %s861_s10 = smov 1  }
 0x157   : > { %618 = dma.vmem_to_hbm [thread:$0]  (%p978_p10), %s1061_s11, 64, %s1059_s7, %s433_s15, %s860_s9, %s860_s9, %s861_s10  }
 0x158 PF: > { %s464_s18 = sand.u32 1, %s827_s12   ;;  %p1134_p12 = scmp.ne.s32.totalorder %s1124_s23, 0 }
 0x159   : > { %p1135_p11 = scmp.ge.s32.totalorder %s847_s17, 2  ;;  %s465_s26 = scalar_lea.sflag [#allocation4], %s464_s18 }
 0x15b   : > { %p629_p0 = pnand %p1135_p11, %p1134_p12 }
 0x15d   : > { %822 = dma.done.wait (!%p629_p0), %s465_s26, 64  }
 0x15e   : > { %824 = vsyncadd (!%p629_p0), %s465_s26, 4294967232  ;;  %s20_s17 = sadd.s32 1, %s847_s17   ;;  %s1136_s12 = smov %s831_s13 }
 0x15f   : > { %p17_p5 = scmp.ge.s32.totalorder %s20_s17, 4   ;;  %s1137_s13 = smov %s835_s14 }
 0x160   : > { %s1138_s14 = smov %s987_s5  ;;  %s1139_s15 = smov %s843_s16 }
 0x161   : > { %s1140_s16 = smov %s1142_s28  ;;  %19 = sbr.rel (!%p17_p5) target bundleno = 7 (0x7), region = 83 }
 0x168   :  { %470 = vsyncpa [#allocation3], 1 }
 0x169   :  { %472 = vsyncpa [#allocation3 + $0x1], 1 }
 0x16a   :  { %473 = vsyncpa [#allocation6], 1 }
 0x16b   :  { %474 = vsyncpa [#allocation4], 1 }
 0x16c   :  { %476 = vsyncpa [#allocation4 + $0x1], 1 }

</bundles_post_ra>
